<compile_context>
chip_gen: v7x
topology: tpu7x:2x2x1
jax: 0.10.0
libtpu: 0.0.40
codegen_flags: <defaults>
</compile_context>

<pallas_src>
import functools
import math

import numpy as np
import jax
import jax.numpy as jnp
from jax.experimental import pallas as pl
from jax.experimental.pallas import tpu as pltpu

_INV_SQRT2 = 1.0 / math.sqrt(2.0)


def _haar_filters():
    # pywt.Wavelet('haar'): rec_lo = [1/sqrt2, 1/sqrt2], rec_hi = [1/sqrt2, -1/sqrt2]
    lo = np.array([_INV_SQRT2, _INV_SQRT2], np.float32)
    hi = np.array([_INV_SQRT2, -_INV_SQRT2], np.float32)
    return lo, hi


def _haar_dwt_matrices(height, width):
    """Banded DWT matrices, exactly as DWT_2D.get_matrix builds them for 'haar'."""
    lo, hi = _haar_filters()
    ho, wo = height // 2, width // 2
    ml0 = np.zeros((ho, height), np.float32)
    mh0 = np.zeros((ho, height), np.float32)
    for i in range(ho):
        ml0[i, 2 * i:2 * i + 2] = lo
        mh0[i, 2 * i:2 * i + 2] = hi
    ml1 = np.zeros((wo, width), np.float32)
    mh1 = np.zeros((wo, width), np.float32)
    for j in range(wo):
        ml1[j, 2 * j:2 * j + 2] = lo
        mh1[j, 2 * j:2 * j + 2] = hi
    # DWT_2D stores the width-axis matrices transposed: shape (W, W//2).
    return ml0, mh0, np.ascontiguousarray(ml1.T), np.ascontiguousarray(mh1.T)


# ---------------------------------------------------------------------------
# Pallas kernel: fused Haar DWT subbands + average
# ---------------------------------------------------------------------------
def _dwt_avg_kernel(x_ref, ml1_ref, mh1_ref, o_ref, *, w):
    xb = x_ref[...]                      # (tm, 2*W): [even image row | odd image row]
    even = xb[:, :w]                     # static lane slices (cheap, no gathers)
    odd = xb[:, w:]
    # Height-axis Haar filtering  (== matrix_low_0 @ x / matrix_high_0 @ x).
    low = (even + odd) * _INV_SQRT2      # (tm, W)
    high = (even - odd) * _INV_SQRT2
    # Width-axis filtering on the MXU with the DWT_2D matrices (W, W//2).
    ml1 = ml1_ref[...]
    mh1 = mh1_ref[...]
    ll = jnp.dot(low, ml1, preferred_element_type=jnp.float32)
    lh = jnp.dot(low, mh1, preferred_element_type=jnp.float32)
    hl = jnp.dot(high, ml1, preferred_element_type=jnp.float32)
    hh = jnp.dot(high, mh1, preferred_element_type=jnp.float32)
    o_ref[...] = (ll + lh + hl + hh) * 0.25


def _round_up(a, b):
    return -(-a // b) * b


@functools.partial(jax.jit, static_argnames=("wavename", "tile_m", "interpret"))
def downsample_v2(x, wavename="haar", *, tile_m=512, interpret=False):
    """Forward pass of Downsample_v2 for NCHW float32 input."""
    # TODO(synk): only the 'haar' filter bank is built in-script (no pywt);
    # longer wavelets (which need row halos across tiles) are not implemented.
    if wavename != "haar":
        raise NotImplementedError("only wavename='haar' is supported")
    n, c, h, w = x.shape
    ho, wo = h // 2, w // 2
    wc = 2 * wo
    xc = x[:, :, : 2 * ho, :wc]                      # DWT_2D ignores odd tails
    m = n * c * ho
    x2d = xc.reshape(m, 2 * wc).astype(jnp.float32)  # row = even|odd image-row pair

    _, _, ml1, mh1 = _haar_dwt_matrices(2 * ho, wc)  # (wc, wo) each
    ml1 = jnp.asarray(ml1)
    mh1 = jnp.asarray(mh1)

    # Row tile: big enough to amortize the ~0.35us per-grid-step overhead,
    # small enough that the double-buffered working set stays inside scoped
    # VMEM on every generation (v5e 16MiB default, v7x 64MiB physical).
    tm = max(8, min(_round_up(tile_m, 8), _round_up(m, 8)))

    def vmem_per_buffer(t):
        return 4 * (t * 2 * wc + t * wo + 2 * wc * wo)

    while tm > 8 and vmem_per_buffer(tm) > 10 * 1024 * 1024:
        tm = max(8, _round_up(tm // 2, 8))

    mp = _round_up(m, tm)
    if mp != m:                                      # keep every tile full (no
        x2d = jnp.pad(x2d, ((0, mp - m), (0, 0)))    # giant-block fallback)

    out2d = pl.pallas_call(
        functools.partial(_dwt_avg_kernel, w=wc),
        out_shape=jax.ShapeDtypeStruct((mp, wo), jnp.float32),
        grid=(mp // tm,),
        in_specs=[
            pl.BlockSpec((tm, 2 * wc), lambda i: (i, 0)),
            pl.BlockSpec((wc, wo), lambda i: (0, 0)),   # grid-invariant weights
            pl.BlockSpec((wc, wo), lambda i: (0, 0)),
        ],
        out_specs=pl.BlockSpec((tm, wo), lambda i: (i, 0)),
        compiler_params=pltpu.CompilerParams(
            dimension_semantics=("parallel",),
            vmem_limit_bytes=48 * 1024 * 1024,
        ),
        interpret=interpret,
    )(x2d, ml1, mh1)

    if mp != m:
        out2d = out2d[:m]
    return out2d.reshape(n, c, ho, wo)


# ---------------------------------------------------------------------------
# Pure-JAX reference mirroring DWT_2D (matrix form) + averaging
# ---------------------------------------------------------------------------
def _ref_downsample_v2(x):
    n, c, h, w = x.shape
    ml0, mh0, ml1, mh1 = _haar_dwt_matrices(h, w)
    ml0, mh0, ml1, mh1 = map(jnp.asarray, (ml0, mh0, ml1, mh1))
    low = jnp.einsum("ih,nchw->nciw", ml0, x)
    high = jnp.einsum("ih,nchw->nciw", mh0, x)
    ll = jnp.einsum("nciw,wj->ncij", low, ml1)
    lh = jnp.einsum("nciw,wj->ncij", low, mh1)
    hl = jnp.einsum("nciw,wj->ncij", high, ml1)
    hh = jnp.einsum("nciw,wj->ncij", high, mh1)
    return (ll + lh + hl + hh) / 4.0


if __name__ == "__main__":
    key = jax.random.PRNGKey(0)
    x = jax.random.normal(key, (2, 4, 16, 16), jnp.float32)   # NCHW, as in PyTorch

    y = jax.block_until_ready(downsample_v2(x))
    assert y.shape == (2, 4, 8, 8), y.shape

    y_ref = jax.block_until_ready(_ref_downsample_v2(x))
    err = float(jnp.max(jnp.abs(y - y_ref)))
    assert err < 5e-2, f"mismatch vs XLA reference: {err}"
    print("KERNEL_OK")
</pallas_src>

<mosaic_0001>
module attributes {stable_mosaic.version = 11 : i64} {
  func.func @_dwt_avg_kernel(%arg0: i32, %arg1: memref<64x32xf32, #tpu.memory_space<vmem>>, %arg2: memref<16x8xf32, #tpu.memory_space<vmem>>, %arg3: memref<16x8xf32, #tpu.memory_space<vmem>>, %arg4: memref<64x8xf32, #tpu.memory_space<vmem>>) attributes {dimension_semantics = [#tpu.dimension_semantics<parallel>], iteration_bounds = array<i64: 1>, scalar_prefetch = 0 : i64, scratch_operands = 0 : i64, tpu.core_type = #tpu.core_type<tc>, window_params = [{transform_indices = @transform_0, window_bounds = array<i64: 64, 32>}, {pipeline_mode = #tpu.pipeline_mode<synchronous>, transform_indices = @transform_1, window_bounds = array<i64: 16, 8>}, {pipeline_mode = #tpu.pipeline_mode<synchronous>, transform_indices = @transform_2, window_bounds = array<i64: 16, 8>}, {transform_indices = @transform_3, window_bounds = array<i64: 64, 8>}]} {
    %c0 = arith.constant 0 : index
    %c0_0 = arith.constant 0 : index
    %0 = vector.load %arg1[%c0, %c0_0] : memref<64x32xf32, #tpu.memory_space<vmem>>, vector<64x32xf32>
    %1 = vector.extract_strided_slice %0 {offsets = [0, 0], sizes = [64, 16], strides = [1, 1]} : vector<64x32xf32> to vector<64x16xf32>
    %2 = vector.extract_strided_slice %0 {offsets = [0, 16], sizes = [64, 16], strides = [1, 1]} : vector<64x32xf32> to vector<64x16xf32>
    %3 = arith.addf %1, %2 : vector<64x16xf32>
    %cst = arith.constant 0.707106769 : f32
    %4 = vector.broadcast %cst : f32 to vector<64x16xf32>
    %5 = arith.mulf %3, %4 : vector<64x16xf32>
    %6 = arith.subf %1, %2 : vector<64x16xf32>
    %cst_1 = arith.constant 0.707106769 : f32
    %7 = vector.broadcast %cst_1 : f32 to vector<64x16xf32>
    %8 = arith.mulf %6, %7 : vector<64x16xf32>
    %c0_2 = arith.constant 0 : index
    %c0_3 = arith.constant 0 : index
    %9 = vector.load %arg2[%c0_2, %c0_3] : memref<16x8xf32, #tpu.memory_space<vmem>>, vector<16x8xf32>
    %c0_4 = arith.constant 0 : index
    %c0_5 = arith.constant 0 : index
    %10 = vector.load %arg3[%c0_4, %c0_5] : memref<16x8xf32, #tpu.memory_space<vmem>>, vector<16x8xf32>
    %cst_6 = arith.constant dense<0.000000e+00> : vector<64x8xf32>
    %11 = tpu.matmul %5, %9, %cst_6 {dimension_numbers = #tpu.dot_dimension_numbers<[1], [0], [0], [1], [0, 0, 1, 1], [], []>} : vector<64x16xf32>, vector<16x8xf32>, vector<64x8xf32> -> vector<64x8xf32>
    %cst_7 = arith.constant dense<0.000000e+00> : vector<64x8xf32>
    %12 = tpu.matmul %5, %10, %cst_7 {dimension_numbers = #tpu.dot_dimension_numbers<[1], [0], [0], [1], [0, 0, 1, 1], [], []>} : vector<64x16xf32>, vector<16x8xf32>, vector<64x8xf32> -> vector<64x8xf32>
    %cst_8 = arith.constant dense<0.000000e+00> : vector<64x8xf32>
    %13 = tpu.matmul %8, %9, %cst_8 {dimension_numbers = #tpu.dot_dimension_numbers<[1], [0], [0], [1], [0, 0, 1, 1], [], []>} : vector<64x16xf32>, vector<16x8xf32>, vector<64x8xf32> -> vector<64x8xf32>
    %cst_9 = arith.constant dense<0.000000e+00> : vector<64x8xf32>
    %14 = tpu.matmul %8, %10, %cst_9 {dimension_numbers = #tpu.dot_dimension_numbers<[1], [0], [0], [1], [0, 0, 1, 1], [], []>} : vector<64x16xf32>, vector<16x8xf32>, vector<64x8xf32> -> vector<64x8xf32>
    %15 = arith.addf %11, %12 : vector<64x8xf32>
    %16 = arith.addf %15, %13 : vector<64x8xf32>
    %17 = arith.addf %16, %14 : vector<64x8xf32>
    %cst_10 = arith.constant 2.500000e-01 : f32
    %18 = vector.broadcast %cst_10 : f32 to vector<64x8xf32>
    %19 = arith.mulf %17, %18 : vector<64x8xf32>
    %c0_11 = arith.constant 0 : index
    %c0_12 = arith.constant 0 : index
    %20 = vector.load %arg4[%c0_11, %c0_12] : memref<64x8xf32, #tpu.memory_space<vmem>>, vector<64x8xf32>
    tpu.vector_store %arg4[%c0_11, %c0_12], %19 {strides = array<i32>} : memref<64x8xf32, #tpu.memory_space<vmem>>, vector<64x8xf32>,
    return
  }
  func.func @transform_0(%arg0: i32) -> (i32, i32) {
    %c0_i32 = arith.constant 0 : i32
    %c0_i32_0 = arith.constant 0 : i32
    return %arg0, %c0_i32 : i32, i32
  }
  func.func @transform_1(%arg0: i32) -> (i32, i32) {
    %c0_i32 = arith.constant 0 : i32
    %c0_i32_0 = arith.constant 0 : i32
    %c0_i32_1 = arith.constant 0 : i32
    return %c0_i32, %c0_i32_0 : i32, i32
  }
  func.func @transform_2(%arg0: i32) -> (i32, i32) {
    %c0_i32 = arith.constant 0 : i32
    %c0_i32_0 = arith.constant 0 : i32
    %c0_i32_1 = arith.constant 0 : i32
    return %c0_i32, %c0_i32_0 : i32, i32
  }
  func.func @transform_3(%arg0: i32) -> (i32, i32) {
    %c0_i32 = arith.constant 0 : i32
    %c0_i32_0 = arith.constant 0 : i32
    return %arg0, %c0_i32 : i32, i32
  }
}

</mosaic_0001>

<bundles_post_ra>
// kernel: downsample_v2.1
= control target key start
LH: loop header
LB: loop body
LE: loop exit
PB: predicated region body
PF: predicated region fallthrough
CT: control target
= control target key end

     0   :  { %s813_s16 = smov 112   ;;  %s925_s0 = inlined_call_operand.vmem [shape: f32[64,32], index: 0, kind: input, shape index: {}]   ;;  %s926_s1 = inlined_call_operand.vmem [shape: f32[16,8], index: 1, kind: input, shape index: {}]   ;;  %s927_s2 = inlined_call_operand.vmem [shape: f32[16,8], index: 2, kind: input, shape index: {}]   ;;  %s928_s3 = inlined_call_operand.hbm [shape: f32[64,8], index: 3, kind: output, shape index: {}]  }
   0x1   :  { %v15_v0 = vld [vmem:[%s925_s0] sm:$0xff]  ;;  %v17_v1 = vld [vmem:[%s925_s0 + $0x10] sm:$0xff]  ;;  %v16_v2 = vld [vmem:[%s925_s0 + $0x8] sm:$0xff] }
   0x2   :  { %31 = vrot.lane.b32.xlu0 %v15_v0, %s813_s16  ;;  %35 = vrot.lane.b32.xlu1 %v17_v1, %s813_s16  ;;  %v18_v3 = vld [vmem:[%s925_s0 + $0x18] sm:$0xff]  ;;  %v89_v4 = vld [vmem:[%s927_s2] sm:$0xff] }
   0x3   :  { %v90_v5 = vld [vmem:[%s927_s2 + $0x8] sm:$0xff]  ;;  %v87_v6 = vld [vmem:[%s926_s1] sm:$0xff] }
   0x4   :  { %v745_v7 = vpack.c.bf16 %v90_v5, %v89_v4  ;;  %v88_v8 = vld [vmem:[%s926_s1 + $0x8] sm:$0xff] }
   0x5   :  { %8 = vsyncpa [#allocation3], 0  ;;  %v749_v9 = vpack.c.bf16 %v88_v8, %v87_v6  ;;  %v19_v10 = vld [vmem:[%s925_s0 + $0x20] sm:$0xff]  ;;  %v20_v11 = vld [vmem:[%s925_s0 + $0x28] sm:$0xff]  ;;  %vm91_vm0 = vcmask 130048   ;;  %vm584_vm1 = vcmask 64512  }
   0x6   :  { %33 = vrot.lane.b32.xlu0 %v16_v2, %s813_s16  ;;  %37 = vrot.lane.b32.xlu1 %v18_v3, %s813_s16  ;;  %v21_v12 = vld [vmem:[%s925_s0 + $0x30] sm:$0xff]  ;;  %v22_v13 = vld [vmem:[%s925_s0 + $0x38] sm:$0xff]  ;;  %s814_s0 = smov [#allocation2]  }
   0x7   :  { %746 = vmatprep.subr.bf16.mxu1 %v745_v7  ;;  %754 = vmatprep.subr.bf16.mxu0 %v745_v7  ;;  %s598_s8 = sshll.u32 %s814_s0, 4  ;;  %s599_s8 = int_to_ptr.vmem [resolvable:$true] %s598_s8 }
   0x8   :  { %748 = vmatpush3.bf16.msra.mxu1 %v745_v7  ;;  %756 = vmatpush3.bf16.msra.mxu0 %v745_v7  ;;  %s789_s9 = scalar_lea.vmem %s599_s8, 1024  ;;  %p794_p1 = scmp.lt.s32.totalorder %s599_s8, %s599_s8 }
   0x9   :  { %750 = vmatprep.subr.bf16.mxu1 %v749_v9  ;;  %758 = vmatprep.subr.bf16.mxu0 %v749_v9  ;;  %p790_p0 = scmp.ne.s32.totalorder %s599_s8, %s789_s9  ;;  %p795_p2 = scmp.lt.s32.totalorder %s789_s9, %s789_s9 }
   0xa   :  { %39 = vrot.lane.b32.xlu0 %v19_v10, %s813_s16  ;;  %41 = vrot.lane.b32.xlu1 %v20_v11, %s813_s16 }
   0xb   :  { %p796_p3 = por %p795_p2, %p794_p1 }
   0xd   :  { %p797_p4 = pnand %p796_p3, %p790_p0 }
   0xe   :  { %43 = vrot.lane.b32.xlu0 %v21_v12, %s813_s16  ;;  %45 = vrot.lane.b32.xlu1 %v22_v13, %s813_s16 }
  0x74   :  { %v32_v14 = vpop.permute.xlu0 %31  ;;  %v36_v15 = vpop.permute.xlu1 %35 }
  0x75   :  { %v55_v16 = vadd.f32 %v32_v14, %v15_v0  ;;  %v71_v17 = vsub.f32 %v15_v0, %v32_v14  ;;  %v57_v18 = vadd.f32 %v36_v15, %v17_v1  ;;  %v73_v19 = vsub.f32 %v17_v1, %v36_v15 }
  0x77   :  { %v63_v20 = vmul.f32 0.70710677, %v55_v16  ;;  %v79_v22 = vmul.f32 0.70710677, %v71_v17  ;;  %v65_v28 = vmul.f32 0.70710677, %v57_v18 }
  0x78   :  { %v34_v21 = vpop.permute.xlu0 %33  ;;  %v38_v23 = vpop.permute.xlu1 %37  ;;  %v81_v29 = vmul.f32 0.70710677, %v73_v19 }
  0x79   :  { %v56_v24 = vadd.f32 %v34_v21, %v16_v2  ;;  %v72_v25 = vsub.f32 %v16_v2, %v34_v21  ;;  %685 = vmatprep.mubr.msk.f32.mxu1 %vm91_vm0, %v63_v20  ;;  %v58_v26 = vadd.f32 %v38_v23, %v18_v3  ;;  %v74_v27 = vsub.f32 %v18_v3, %v38_v23 }
  0x7a   :  { %717 = vmatprep.mubr.msk.f32.mxu0 %vm91_vm0, %v79_v22 }
  0x7b   :  { %v64_v30 = vmul.f32 0.70710677, %v56_v24  ;;  %v80_v31 = vmul.f32 0.70710677, %v72_v25  ;;  %v66_v32 = vmul.f32 0.70710677, %v58_v26 }
  0x7c   :  { %v40_v33 = vpop.permute.xlu0 %39  ;;  %v42_v34 = vpop.permute.xlu1 %41  ;;  %v82_v35 = vmul.f32 0.70710677, %v74_v27 }
  0x7d   :  { %686 = vmatmul.mubr.msk.f32.vlgmr.msra.gmra.mrb[0].mxu1 %vm91_vm0, %v64_v30  ;;  %718 = vmatmul.mubr.msk.f32.vlgmr.msra.gmra.mrb[0].mxu0 %vm91_vm0, %v80_v31  ;;  %v59_v36 = vadd.f32 %v40_v33, %v19_v10  ;;  %v75_v37 = vsub.f32 %v19_v10, %v40_v33  ;;  %v60_v38 = vadd.f32 %v42_v34, %v20_v11 }
  0x7e   :  { %752 = vmatpush3.bf16.msra.mxu1 %v749_v9  ;;  %760 = vmatpush3.bf16.msra.mxu0 %v749_v9  ;;  %v76_v39 = vsub.f32 %v20_v11, %v42_v34 }
  0x7f   :  { %688 = vmatprep.mubr.msk.f32.mxu1 %vm91_vm0, %v65_v28  ;;  %720 = vmatprep.mubr.msk.f32.mxu0 %vm91_vm0, %v81_v29  ;;  %v67_v40 = vmul.f32 0.70710677, %v59_v36  ;;  %v83_v41 = vmul.f32 0.70710677, %v75_v37  ;;  %v68_v42 = vmul.f32 0.70710677, %v60_v38 }
  0x80   :  { %v44_v43 = vpop.permute.xlu0 %43  ;;  %v46_v44 = vpop.permute.xlu1 %45  ;;  %v84_v45 = vmul.f32 0.70710677, %v76_v39 }
  0x81   :  { %689 = vmatmul.mubr.msk.f32.gmra.mrb[2].mxu1 %vm91_vm0, %v66_v32  ;;  %721 = vmatmul.mubr.msk.f32.gmra.mrb[2].mxu0 %vm91_vm0, %v82_v35  ;;  %v61_v46 = vadd.f32 %v44_v43, %v21_v12  ;;  %v77_v47 = vsub.f32 %v21_v12, %v44_v43  ;;  %v62_v48 = vadd.f32 %v46_v44, %v22_v13 }
  0x82   :  { %v78_v49 = vsub.f32 %v22_v13, %v46_v44  ;;  %691 = vmatprep.mubr.msk.f32.mxu1 %vm91_vm0, %v67_v40  ;;  %723 = vmatprep.mubr.msk.f32.mxu0 %vm91_vm0, %v83_v41 }
  0x83   :  { %v69_v50 = vmul.f32 0.70710677, %v61_v46  ;;  %v85_v51 = vmul.f32 0.70710677, %v77_v47  ;;  %v70_v52 = vmul.f32 0.70710677, %v62_v48 }
  0x84   :  { %v86_v53 = vmul.f32 0.70710677, %v78_v49 }
  0x85   :  { %692 = vmatmul.mubr.msk.f32.gmra.mrb[4].mxu1 %vm91_vm0, %v68_v42  ;;  %724 = vmatmul.mubr.msk.f32.gmra.mrb[4].mxu0 %vm91_vm0, %v84_v45 }
  0x86   :  { %694 = vmatprep.mubr.msk.f32.mxu1 %vm91_vm0, %v69_v50  ;;  %726 = vmatprep.mubr.msk.f32.mxu0 %vm91_vm0, %v85_v51 }
  0x89   :  { %695 = vmatmul.mubr.msk.f32.gmra.mrb[6].mxu1 %vm91_vm0, %v70_v52  ;;  %727 = vmatmul.mubr.msk.f32.gmra.mrb[6].mxu0 %vm91_vm0, %v86_v53 }
  0x8a   :  { %701 = vmatprep.mubr.msk.f32.mxu1 %vm91_vm0, %v79_v22  ;;  %733 = vmatprep.mubr.msk.f32.mxu0 %vm91_vm0, %v63_v20 }
  0x8d   :  { %702 = vmatmul.mubr.msk.f32.vlgmr.msra.gmra.mrb[0].mxu1 %vm91_vm0, %v80_v31  ;;  %734 = vmatmul.mubr.msk.f32.vlgmr.msra.gmra.mrb[0].mxu0 %vm91_vm0, %v64_v30 }
  0x8e   :  { %704 = vmatprep.mubr.msk.f32.mxu1 %vm91_vm0, %v81_v29  ;;  %736 = vmatprep.mubr.msk.f32.mxu0 %vm91_vm0, %v65_v28 }
  0x91   :  { %705 = vmatmul.mubr.msk.f32.gmra.mrb[2].mxu1 %vm91_vm0, %v82_v35  ;;  %737 = vmatmul.mubr.msk.f32.gmra.mrb[2].mxu0 %vm91_vm0, %v66_v32 }
  0x92   :  { %707 = vmatprep.mubr.msk.f32.mxu1 %vm91_vm0, %v83_v41  ;;  %739 = vmatprep.mubr.msk.f32.mxu0 %vm91_vm0, %v67_v40 }
  0x95   :  { %708 = vmatmul.mubr.msk.f32.gmra.mrb[4].mxu1 %vm91_vm0, %v84_v45  ;;  %740 = vmatmul.mubr.msk.f32.gmra.mrb[4].mxu0 %vm91_vm0, %v68_v42 }
  0x96   :  { %710 = vmatprep.mubr.msk.f32.mxu1 %vm91_vm0, %v85_v51  ;;  %742 = vmatprep.mubr.msk.f32.mxu0 %vm91_vm0, %v69_v50 }
  0x99   :  { %711 = vmatmul.mubr.msk.f32.gmra.mrb[6].mxu1 %vm91_vm0, %v86_v53  ;;  %743 = vmatmul.mubr.msk.f32.gmra.mrb[6].mxu0 %vm91_vm0, %v70_v52 }
 0x160   :  { %v703_v54 = vpop.f32.mrb[0].mxu1  ;;  %v735_v55 = vpop.f32.mrb[0].mxu0 }
 0x161   :  { %v761_v56 = vadd.f32 %v735_v55, %v703_v54  ;;  %v311_v57 = vpop.f32.mrb[1].mxu1  ;;  %v521_v58 = vpop.f32.mrb[1].mxu0 }
 0x162   :  { %v762_v59 = vadd.f32 %v521_v58, %v311_v57 }
 0x163   :  { %v577_v60 = vmul.f32 0.25, %v761_v56 }
 0x164   :  { %v576_v61 = vmul.f32 0.25, %v762_v59  ;;  %v706_v62 = vpop.f32.mrb[2].mxu1  ;;  %v738_v63 = vpop.f32.mrb[2].mxu0 }
 0x165   :  { %586 = vst.msk [vmem:[#allocation2 + $0x8] sm:$0xff] %vm584_vm1, %v577_v60  ;;  %v763_v0 = vadd.f32 %v738_v63, %v706_v62  ;;  %v321_v1 = vpop.f32.mrb[3].mxu1  ;;  %v531_v2 = vpop.f32.mrb[3].mxu0 }
 0x166   :  { %585 = vst.msk [vmem:[#allocation2] sm:$0xff] %vm584_vm1, %v576_v61  ;;  %v764_v3 = vadd.f32 %v531_v2, %v321_v1 }
 0x167   :  { %v579_v4 = vmul.f32 0.25, %v763_v0 }
 0x168   :  { %v578_v5 = vmul.f32 0.25, %v764_v3  ;;  %v709_v6 = vpop.f32.mrb[4].mxu1  ;;  %v741_v7 = vpop.f32.mrb[4].mxu0 }
 0x169   :  { %588 = vst.msk [vmem:[#allocation2 + $0x18] sm:$0xff] %vm584_vm1, %v579_v4  ;;  %v765_v8 = vadd.f32 %v741_v7, %v709_v6  ;;  %v331_v9 = vpop.f32.mrb[5].mxu1  ;;  %v541_v10 = vpop.f32.mrb[5].mxu0 }
 0x16a   :  { %587 = vst.msk [vmem:[#allocation2 + $0x10] sm:$0xff] %vm584_vm1, %v578_v5  ;;  %v766_v11 = vadd.f32 %v541_v10, %v331_v9 }
 0x16b   :  { %v581_v12 = vmul.f32 0.25, %v765_v8 }
 0x16c   :  { %v580_v13 = vmul.f32 0.25, %v766_v11  ;;  %v712_v14 = vpop.f32.mrb[6].mxu1  ;;  %v744_v15 = vpop.f32.mrb[6].mxu0 }
 0x16d   :  { %590 = vst.msk [vmem:[#allocation2 + $0x28] sm:$0xff] %vm584_vm1, %v581_v12  ;;  %v767_v16 = vadd.f32 %v744_v15, %v712_v14  ;;  %v341_v17 = vpop.f32.mrb[7].mxu1  ;;  %v551_v18 = vpop.f32.mrb[7].mxu0 }
 0x16e   :  { %589 = vst.msk [vmem:[#allocation2 + $0x20] sm:$0xff] %vm584_vm1, %v580_v13  ;;  %v768_v19 = vadd.f32 %v551_v18, %v341_v17 }
 0x16f   :  { %v583_v20 = vmul.f32 0.25, %v767_v16 }
 0x170   :  { %v582_v21 = vmul.f32 0.25, %v768_v19 }
 0x171   :  { %592 = vst.msk [vmem:[#allocation2 + $0x38] sm:$0xff] %vm584_vm1, %v583_v20 }
 0x172   :  { %591 = vst.msk [vmem:[#allocation2 + $0x30] sm:$0xff] %vm584_vm1, %v582_v21 }
 0x173   :  { %800 = shalt.err (!%p797_p4)
}
 0x174   :  { %s801_s12 = scalar_lea.hbm %s928_s3, 1024 }
 0x175   :  { %p802_p5 = scmp.ne.s32.totalorder %s928_s3, %s801_s12  ;;  %p805_p6 = scmp.lt.u32.totalorder %s801_s12, %s928_s3 }
 0x177   :  { %p807_p7 = pnand %p805_p6, %p802_p5 }
 0x179   :  { %810 = shalt.err (!%p807_p7)
}
 0x17a   :  { %s815_s17 = smov 128   ;;  %s816_s18 = smov 8  }
 0x17b   :  { %604 = dma.vmem_to_hbm [thread:$0]  %s599_s8, 1024, %s928_s3, [#allocation3], %s815_s17, %s815_s17, %s816_s18  }
 0x17c   :  { %811 = dma.done.wait [#allocation3], 1024  }
 0x17d   :  { %812 = vsyncadd [#allocation3], 4294966272 }
 0x17e   :  { %608 = vsyncpa [#allocation3], 1 }

</bundles_post_ra>
